<compile_context>
chip_gen: v5e
topology: v5e:2x2
jax: 0.10.0
libtpu: 0.0.40
codegen_flags: <defaults>
</compile_context>

<pallas_src>
import jax
import jax.numpy as jnp
import numpy as np
from jax.experimental import pallas as pl
from jax.experimental.pallas import tpu as pltpu


# ---------------------------------------------------------------------------
# helpers
# ---------------------------------------------------------------------------
def _round_up(x, m):
    return ((x + m - 1) // m) * m


def _pick_block_rows(batch, cap=512):
    """Row-tile size: multiple of 8, <= cap, >= 2 grid steps for moderate
    batches (v7x dual-TC), and a divisor of the 8-padded batch for large
    batches so no full-array pad copy is needed."""
    b8 = _round_up(batch, 8)
    if b8 <= 64:
        return b8
    if b8 <= 2 * cap:
        return _round_up(-(-b8 // 2), 8)          # aim for exactly 2 tiles
    best = 8
    d = 8
    while d <= cap:
        if b8 % d == 0:
            best = d
        d += 8
    return best if best >= 128 else cap


# ---------------------------------------------------------------------------
# One-time parameter preparation: fold rot90 + agent mask into block-diagonal
# per-agent weights and pack into one weight slab + one bias slab.
# ---------------------------------------------------------------------------
def prepare_critic_params(params, agent_masks, n_agents, obs_shape, act_shape):
    """params: (w1, b1, w2, b2, w3, b3), weights stored as (in, out).
    agent_masks: (A, Ha, Wa).  Returns (w_slab, aux, (dinp, dact, hidden))."""
    w1, b1, w2, b2, w3, b3 = [np.asarray(p, dtype=np.float32) for p in params]
    C, H, W = obs_shape
    Ha, Wa = act_shape
    dinp = C * H * W
    dact = Ha * Wa
    hidden = w1.shape[1]
    A = n_agents
    AH = A * hidden
    assert w1.shape[0] == dinp + dact
    assert w3.shape[1] == 1, "critic head must have a single output"

    angle_multiplier = 2 if n_agents == 2 else 1

    w1_inp = w1[:dinp]                 # (dinp, hidden)
    w1_act = w1[dinp:]                 # (dact, hidden)
    inp_idx = np.arange(dinp).reshape(C, H, W)
    act_idx = np.arange(dact).reshape(Ha, Wa)
    masks = np.asarray(agent_masks).reshape(A, dact).astype(np.float32)

    w1i_bd = np.zeros((A * dinp, AH), np.float32)
    w1a_bd = np.zeros((A * dact, AH), np.float32)
    w2_bd = np.zeros((AH, AH), np.float32)
    w3_bd = np.zeros((AH, AH), np.float32)     # only columns [0, A) are nonzero

    for a in range(A):
        k = a * angle_multiplier
        # flatten(rot90(X, k))[j] == X_flat[perm[j]]  ->  fold the inverse
        # permutation into the weight rows (exact, no numerics change).
        perm_inp = np.rot90(inp_idx, k, axes=(1, 2)).reshape(-1)
        perm_act = np.rot90(act_idx, k, axes=(0, 1)).reshape(-1)
        inv_inp = np.argsort(perm_inp)
        inv_act = np.argsort(perm_act)
        w1i_bd[a * dinp:(a + 1) * dinp, a * hidden:(a + 1) * hidden] = w1_inp[inv_inp]
        # mask is applied to actions BEFORE rotation (original feature index),
        # i.e. multiply the already inverse-permuted rows by the raw mask.
        w1a_bd[a * dact:(a + 1) * dact, a * hidden:(a + 1) * hidden] = (
            masks[a][:, None] * w1_act[inv_act])
        w2_bd[a * hidden:(a + 1) * hidden, a * hidden:(a + 1) * hidden] = w2
        w3_bd[a * hidden:(a + 1) * hidden, a] = w3[:, 0]

    w_slab = jnp.asarray(np.concatenate([w1i_bd, w1a_bd, w2_bd, w3_bd], axis=0))

    b3_scalar = float(np.reshape(b3, (-1,))[0])
    aux = jnp.asarray(np.stack([np.tile(b1, A),                       # row 0: b1 tiled
                                np.tile(b2, A),                       # row 1: b2 tiled
                                np.full((AH,), b3_scalar, np.float32)  # row 2: b3
                                ], axis=0))                           # (3, AH)
    return w_slab, aux, (dinp, dact, hidden)


# ---------------------------------------------------------------------------
# Pallas kernel: whole critic (all agents) = 4 lane-dense MXU dots per tile
# ---------------------------------------------------------------------------
def mlp_critic_pallas(x_inp, x_act, w_slab, aux, *, n_agents, dinp, dact, hidden):
    """x_inp: (B, A*dinp), x_act: (B, A*dact) -> (B, A) float32."""
    B = x_inp.shape[0]
    A = n_agents
    AH = A * hidden
    Din = A * dinp
    Dact = A * dact
    off_w2 = Din + Dact
    off_w3 = off_w2 + AH

    block_rows = _pick_block_rows(B)
    B_pad = _round_up(_round_up(B, 8), block_rows)
    grid = (B_pad // block_rows,)
    if B_pad != B:
        x_inp = jnp.pad(x_inp, ((0, B_pad - B), (0, 0)))
        x_act = jnp.pad(x_act, ((0, B_pad - B), (0, 0)))

    def kernel(x_inp_ref, x_act_ref, w_ref, aux_ref, out_ref):
        b1 = aux_ref[0:1, :]                       # (1, AH), pre-tiled
        b2 = aux_ref[1:2, :]                       # (1, AH), pre-tiled
        b3 = aux_ref[2:3, 0:A]                     # (1, A)
        w1i = w_ref[0:Din, :]                      # (A*dinp, AH) block-diag
        w1a = w_ref[Din:off_w2, :]                 # (A*dact, AH) block-diag
        w2 = w_ref[off_w2:off_w3, :]               # (AH, AH)     block-diag
        w3 = w_ref[off_w3:off_w3 + AH, :]          # (AH, AH), cols >= A are 0

        h1 = (jnp.dot(x_inp_ref[...], w1i, preferred_element_type=jnp.float32)
              + jnp.dot(x_act_ref[...], w1a, preferred_element_type=jnp.float32)
              + b1)
        h1 = jnp.maximum(h1, 0.0)
        h2 = jnp.maximum(
            jnp.dot(h1, w2, preferred_element_type=jnp.float32) + b2, 0.0)
        q = jnp.dot(h2, w3, preferred_element_type=jnp.float32)   # (rows, AH)
        out_ref[...] = q[:, 0:A] + b3              # single (rows, A) store

    flops = 2 * B_pad * AH * (Din + Dact + AH + AH)
    bytes_accessed = 4 * (x_inp.size + x_act.size + w_slab.size + aux.size + B_pad * A)

    # Explicit scoped-VMEM budget (double-buffered tiles + weights + slack);
    # safely under v5e's 16 MiB default and v7x's 64 MiB physical VMEM.
    vmem_needed = 4 * (2 * block_rows * (Din + Dact)       # inputs (2 bufs)
                       + 2 * block_rows * A                # output (2 bufs)
                       + int(w_slab.size) + int(aux.size)  # resident weights
                       + 3 * block_rows * AH)              # h1/h2/q live values
    vmem_limit = int(min(max(2 * vmem_needed, 16 << 20), 32 << 20))

    # NOTE: w_slab / aux have constant index maps; pipeline_mode=pl.Buffered(1)
    # would save a few hundred KiB of VMEM but is skipped for robustness.
    return pl.pallas_call(
        kernel,
        out_shape=jax.ShapeDtypeStruct((B_pad, A), jnp.float32),
        grid=grid,
        in_specs=[
            pl.BlockSpec((block_rows, Din), lambda i: (i, 0)),
            pl.BlockSpec((block_rows, Dact), lambda i: (i, 0)),
            pl.BlockSpec(w_slab.shape, lambda i: (0, 0)),   # VMEM-resident
            pl.BlockSpec(aux.shape, lambda i: (0, 0)),      # VMEM-resident
        ],
        out_specs=pl.BlockSpec((block_rows, A), lambda i: (i, 0)),
        compiler_params=pltpu.CompilerParams(
            dimension_semantics=("parallel",),
            vmem_limit_bytes=vmem_limit),
        cost_estimate=pl.CostEstimate(
            flops=int(flops), transcendentals=0,
            bytes_accessed=int(bytes_accessed)),
    )(x_inp, x_act, w_slab, aux)[:B]


# ---------------------------------------------------------------------------
# Module forward: two free reshapes + one pallas_call
# ---------------------------------------------------------------------------
def mlp_critic_adaptive_optics_forward(inputs, hidden_state, actions, packed,
                                       n_agents):
    """inputs: (B, A, C, H, W); actions: (B, A, Ha, Wa).
    Returns (qs, hidden_state) with qs of shape (B, A, 1)."""
    w_slab, aux, (dinp, dact, hidden) = packed
    B, A = inputs.shape[:2]
    assert A == n_agents
    x_inp = inputs.reshape(B, A * dinp).astype(jnp.float32)   # (B, 512) lane-dense
    x_act = actions.reshape(B, A * dact).astype(jnp.float32)  # (B, 256) lane-dense
    qs = mlp_critic_pallas(x_inp, x_act, w_slab, aux,
                           n_agents=A, dinp=dinp, dact=dact, hidden=hidden)
    return qs.reshape(B, A, 1), hidden_state


# ---------------------------------------------------------------------------
# Pure-JAX reference of the ORIGINAL (rot90 / mask / 3 Linear) math
# ---------------------------------------------------------------------------
def _ref_forward(inputs, actions, params, agent_masks, n_agents):
    w1, b1, w2, b2, w3, b3 = params
    angle_multiplier = 2 if n_agents == 2 else 1
    actions = actions * agent_masks
    B = inputs.shape[0]
    qs = []
    for i in range(n_agents):
        inp_i = jnp.rot90(inputs[:, i], k=i * angle_multiplier,
                          axes=(2, 3)).reshape(B, -1)
        act_i = jnp.rot90(actions[:, i], k=i * angle_multiplier,
                          axes=(1, 2)).reshape(B, -1)
        x = jnp.concatenate([inp_i, act_i], axis=-1)
        h1 = jnp.maximum(x @ w1 + b1, 0.0)
        h2 = jnp.maximum(h1 @ w2 + b2, 0.0)
        qs.append(h2 @ w3 + b3)
    return jnp.stack(qs, axis=1)   # (B, A, 1)


if __name__ == "__main__":
    key = jax.random.PRNGKey(0)

    # Small config consistent with the adaptive-optics critic:
    # 4 agents, per-agent obs (C=2, H=8, W=8), per-agent action (8, 8),
    # hidden_dim=32, n_critic_net_outputs=1.
    B, A = 2, 4
    C, H, W = 2, 8, 8
    Ha, Wa = 8, 8
    hidden_dim = 32
    n_out = 1

    dinp = C * H * W
    dact = Ha * Wa
    D = dinp + dact

    ks = jax.random.split(key, 8)
    inputs = jax.random.normal(ks[0], (B, A, C, H, W), dtype=jnp.float32)
    actions = jax.random.normal(ks[1], (B, A, Ha, Wa), dtype=jnp.float32)
    hidden_state = jnp.zeros((1, hidden_dim), dtype=jnp.float32)

    # Deterministic binary agent masks (args.agent_masks analogue).
    agent_masks = (
        (jnp.arange(A * Ha * Wa, dtype=jnp.int32).reshape(A, Ha, Wa) % 3) != 0
    ).astype(jnp.float32)

    # Deterministic parameter init (weights stored as (in, out)).
    scale = 0.05
    w1 = scale * jax.random.normal(ks[2], (D, hidden_dim), dtype=jnp.float32)
    b1 = scale * jax.random.normal(ks[3], (hidden_dim,), dtype=jnp.float32)
    w2 = scale * jax.random.normal(ks[4], (hidden_dim, hidden_dim), dtype=jnp.float32)
    b2 = scale * jax.random.normal(ks[5], (hidden_dim,), dtype=jnp.float32)
    w3 = scale * jax.random.normal(ks[6], (hidden_dim, n_out), dtype=jnp.float32)
    b3 = scale * jax.random.normal(ks[7], (n_out,), dtype=jnp.float32)
    params = (w1, b1, w2, b2, w3, b3)

    # One-time fold of rot90 permutations + agent mask into block-diag weights.
    packed = prepare_critic_params(params, agent_masks, A, (C, H, W), (Ha, Wa))

    qs, h_out = mlp_critic_adaptive_optics_forward(
        inputs, hidden_state, actions, packed, n_agents=A)
    qs = jax.block_until_ready(qs)

    # Silent correctness check vs. the original-math reference.
    qs_ref = _ref_forward(inputs, actions, params, agent_masks, A)
    assert qs.shape == (B, A, 1)
    assert h_out.shape == hidden_state.shape
    assert jnp.allclose(qs, qs_ref, atol=1e-5, rtol=1e-5), (
        float(jnp.max(jnp.abs(qs - qs_ref))))

    print("KERNEL_OK")
</pallas_src>

<mosaic_0001>
module attributes {stable_mosaic.version = 11 : i64} {
  func.func @kernel(%arg0: i32, %arg1: memref<8x512xf32, #tpu.memory_space<vmem>>, %arg2: memref<8x256xf32, #tpu.memory_space<vmem>>, %arg3: memref<1024x128xf32, #tpu.memory_space<vmem>>, %arg4: memref<3x128xf32, #tpu.memory_space<vmem>>, %arg5: memref<8x4xf32, #tpu.memory_space<vmem>>) attributes {dimension_semantics = [#tpu.dimension_semantics<parallel>], iteration_bounds = array<i64: 1>, scalar_prefetch = 0 : i64, scratch_operands = 0 : i64, tpu.core_type = #tpu.core_type<tc>, window_params = [{transform_indices = @transform_0, window_bounds = array<i64: 8, 512>}, {transform_indices = @transform_1, window_bounds = array<i64: 8, 256>}, {pipeline_mode = #tpu.pipeline_mode<synchronous>, transform_indices = @transform_2, window_bounds = array<i64: 1024, 128>}, {pipeline_mode = #tpu.pipeline_mode<synchronous>, transform_indices = @transform_3, window_bounds = array<i64: 3, 128>}, {transform_indices = @transform_4, window_bounds = array<i64: 8, 4>}]} {
    %c0 = arith.constant 0 : index
    %c0_0 = arith.constant 0 : index
    %0 = vector.load %arg4[%c0, %c0_0] : memref<3x128xf32, #tpu.memory_space<vmem>>, vector<1x128xf32>
    %c1 = arith.constant 1 : index
    %c0_1 = arith.constant 0 : index
    %1 = vector.load %arg4[%c1, %c0_1] : memref<3x128xf32, #tpu.memory_space<vmem>>, vector<1x128xf32>
    %c2 = arith.constant 2 : index
    %c0_2 = arith.constant 0 : index
    %2 = vector.load %arg4[%c2, %c0_2] : memref<3x128xf32, #tpu.memory_space<vmem>>, vector<1x4xf32>
    %c0_3 = arith.constant 0 : index
    %c0_4 = arith.constant 0 : index
    %3 = vector.load %arg3[%c0_3, %c0_4] : memref<1024x128xf32, #tpu.memory_space<vmem>>, vector<512x128xf32>
    %c512 = arith.constant 512 : index
    %c0_5 = arith.constant 0 : index
    %4 = vector.load %arg3[%c512, %c0_5] : memref<1024x128xf32, #tpu.memory_space<vmem>>, vector<256x128xf32>
    %c768 = arith.constant 768 : index
    %c0_6 = arith.constant 0 : index
    %5 = vector.load %arg3[%c768, %c0_6] : memref<1024x128xf32, #tpu.memory_space<vmem>>, vector<128x128xf32>
    %c896 = arith.constant 896 : index
    %c0_7 = arith.constant 0 : index
    %6 = vector.load %arg3[%c896, %c0_7] : memref<1024x128xf32, #tpu.memory_space<vmem>>, vector<128x128xf32>
    %c0_8 = arith.constant 0 : index
    %c0_9 = arith.constant 0 : index
    %7 = vector.load %arg1[%c0_8, %c0_9] : memref<8x512xf32, #tpu.memory_space<vmem>>, vector<8x512xf32>
    %cst = arith.constant dense<0.000000e+00> : vector<8x128xf32>
    %8 = tpu.matmul %7, %3, %cst {dimension_numbers = #tpu.dot_dimension_numbers<[1], [0], [0], [1], [0, 0, 1, 1], [], []>} : vector<8x512xf32>, vector<512x128xf32>, vector<8x128xf32> -> vector<8x128xf32>
    %c0_10 = arith.constant 0 : index
    %c0_11 = arith.constant 0 : index
    %9 = vector.load %arg2[%c0_10, %c0_11] : memref<8x256xf32, #tpu.memory_space<vmem>>, vector<8x256xf32>
    %cst_12 = arith.constant dense<0.000000e+00> : vector<8x128xf32>
    %10 = tpu.matmul %9, %4, %cst_12 {dimension_numbers = #tpu.dot_dimension_numbers<[1], [0], [0], [1], [0, 0, 1, 1], [], []>} : vector<8x256xf32>, vector<256x128xf32>, vector<8x128xf32> -> vector<8x128xf32>
    %11 = arith.addf %8, %10 : vector<8x128xf32>
    %12 = vector.broadcast %0 : vector<1x128xf32> to vector<8x128xf32>
    %13 = arith.addf %11, %12 : vector<8x128xf32>
    %cst_13 = arith.constant 0.000000e+00 : f32
    %14 = vector.broadcast %cst_13 : f32 to vector<8x128xf32>
    %15 = arith.maximumf %13, %14 : vector<8x128xf32>
    %cst_14 = arith.constant dense<0.000000e+00> : vector<8x128xf32>
    %16 = tpu.matmul %15, %5, %cst_14 {dimension_numbers = #tpu.dot_dimension_numbers<[1], [0], [0], [1], [0, 0, 1, 1], [], []>} : vector<8x128xf32>, vector<128x128xf32>, vector<8x128xf32> -> vector<8x128xf32>
    %17 = vector.broadcast %1 : vector<1x128xf32> to vector<8x128xf32>
    %18 = arith.addf %16, %17 : vector<8x128xf32>
    %cst_15 = arith.constant 0.000000e+00 : f32
    %19 = vector.broadcast %cst_15 : f32 to vector<8x128xf32>
    %20 = arith.maximumf %18, %19 : vector<8x128xf32>
    %cst_16 = arith.constant dense<0.000000e+00> : vector<8x128xf32>
    %21 = tpu.matmul %20, %6, %cst_16 {dimension_numbers = #tpu.dot_dimension_numbers<[1], [0], [0], [1], [0, 0, 1, 1], [], []>} : vector<8x128xf32>, vector<128x128xf32>, vector<8x128xf32> -> vector<8x128xf32>
    %22 = vector.extract_strided_slice %21 {offsets = [0, 0], sizes = [8, 4], strides = [1, 1]} : vector<8x128xf32> to vector<8x4xf32>
    %23 = vector.broadcast %2 : vector<1x4xf32> to vector<8x4xf32>
    %24 = arith.addf %22, %23 : vector<8x4xf32>
    %c0_17 = arith.constant 0 : index
    %c0_18 = arith.constant 0 : index
    %25 = vector.load %arg5[%c0_17, %c0_18] : memref<8x4xf32, #tpu.memory_space<vmem>>, vector<8x4xf32>
    tpu.vector_store %arg5[%c0_17, %c0_18], %24 {strides = array<i32>} : memref<8x4xf32, #tpu.memory_space<vmem>>, vector<8x4xf32>,
    return
  }
  func.func @transform_0(%arg0: i32) -> (i32, i32) {
    %c0_i32 = arith.constant 0 : i32
    %c0_i32_0 = arith.constant 0 : i32
    return %arg0, %c0_i32 : i32, i32
  }
  func.func @transform_1(%arg0: i32) -> (i32, i32) {
    %c0_i32 = arith.constant 0 : i32
    %c0_i32_0 = arith.constant 0 : i32
    return %arg0, %c0_i32 : i32, i32
  }
  func.func @transform_2(%arg0: i32) -> (i32, i32) {
    %c0_i32 = arith.constant 0 : i32
    %c0_i32_0 = arith.constant 0 : i32
    %c0_i32_1 = arith.constant 0 : i32
    return %c0_i32, %c0_i32_0 : i32, i32
  }
  func.func @transform_3(%arg0: i32) -> (i32, i32) {
    %c0_i32 = arith.constant 0 : i32
    %c0_i32_0 = arith.constant 0 : i32
    %c0_i32_1 = arith.constant 0 : i32
    return %c0_i32, %c0_i32_0 : i32, i32
  }
  func.func @transform_4(%arg0: i32) -> (i32, i32) {
    %c0_i32 = arith.constant 0 : i32
    %c0_i32_0 = arith.constant 0 : i32
    return %arg0, %c0_i32 : i32, i32
  }
}

</mosaic_0001>

<bundles_post_ra>
// kernel: tpu_custom_call.1
= control target key start
LH: loop header
LB: loop body
LE: loop exit
PB: predicated region body
PF: predicated region fallthrough
CT: control target
= control target key end

     0   :  { %9 = vsyncpa [#allocation3], 0  ;;  %s544_s0 = inlined_call_operand.hbm [shape: f32[8,512], index: 0, kind: input, shape index: {}]   ;;  %s545_s1 = inlined_call_operand.hbm [shape: f32[8,256], index: 1, kind: input, shape index: {}]   ;;  %s546_s2 = inlined_call_operand.hbm [shape: f32[1024,128], index: 2, kind: input, shape index: {}]   ;;  %s547_s3 = inlined_call_operand.hbm [shape: f32[3,128], index: 3, kind: input, shape index: {}]   ;;  %s548_s4 = inlined_call_operand.vmem [shape: f32[8,4], index: 4, kind: output, shape index: {}]  }
   0x1   :  { %10 = vsyncpa [#allocation5], 0  ;;  %s28_s17 = sshll.u32 %s545_s1, 4  ;;  %s29_s17 = int_to_ptr.hbm [resolvable:$true] %s28_s17 }
   0x2   :  { %11 = vsyncpa [#allocation8], 0  ;;  %s498_s18 = smov [#allocation4]   ;;  %s17_s22 = sshll.u32 %s544_s0, 4  ;;  %s18_s22 = int_to_ptr.hbm [resolvable:$true] %s17_s22 }
   0x3   :  { %s30_s19 = sshll.u32 %s498_s18, 4  ;;  %s499_s23 = smov [#allocation2]   ;;  %s31_s19 = int_to_ptr.vmem [resolvable:$true] %s30_s19 }
   0x4   :  { %33 = dma.hbm_to_vmem [thread:$0]  %s29_s17, 256, %s31_s19, [#allocation5]  }
   0x5   :  { %s19_s24 = sshll.u32 %s499_s23, 4  ;;  %s38_s27 = sshll.u32 %s546_s2, 4  ;;  %s20_s24 = int_to_ptr.vmem [resolvable:$true] %s19_s24  ;;  %s39_s27 = int_to_ptr.hbm [resolvable:$true] %s38_s27 }
   0x6   :  { %22 = dma.hbm_to_vmem [thread:$0]  %s18_s22, 512, %s20_s24, [#allocation3]  }
   0x7   :  { %s500_s1 = smov [#allocation6]   ;;  %s52_s5 = sshll.u32 %s547_s3, 4  ;;  %s53_s5 = int_to_ptr.hbm [resolvable:$true] %s52_s5 }
   0x8   :  { %s40_s28 = sshll.u32 %s500_s1, 4  ;;  %s501_s6 = smov 128   ;;  %s41_s28 = int_to_ptr.vmem [resolvable:$true] %s40_s28 }
   0x9   :  { %s502_s0 = smov 8   ;;  %s503_s7 = smov [#allocation7]  }
   0xa   :  { %46 = dma.hbm_to_vmem [thread:$0]  %s39_s27, 16384, %s41_s28, [#allocation5], %s501_s6, %s501_s6, %s502_s0  }
   0xb   :  { %s54_s8 = sshll.u32 %s503_s7, 4  ;;  %s55_s8 = int_to_ptr.vmem [resolvable:$true] %s54_s8 }
   0xc   :  { %57 = dma.hbm_to_vmem [thread:$0]  %s53_s5, 64, %s55_s8, [#allocation8]  }
   0xd   :  { %492 = dma.done.wait [#allocation3], 512  }
   0xe   :  { %493 = vsyncadd [#allocation3], 4294966784 }
   0xf   :  { %494 = dma.done.wait [#allocation5], 16640  }
  0x10   :  { %495 = vsyncadd [#allocation5], 4294950656 }
  0x11   :  { %496 = dma.done.wait [#allocation8], 64  }
  0x12   :  { %497 = vsyncadd [#allocation8], 4294967232  ;;  %v156_v0 = vld [vmem:[#allocation6 + $0x278] sm:$0xff]  ;;  %v155_v1 = vld [vmem:[#allocation6 + $0x270] sm:$0xff]  ;;  %vm378_vm0 = vcmask 31744  }
  0x13   :  { %v172_v2 = vld [vmem:[#allocation6 + $0x2f8] sm:$0xff]  ;;  %211 = vmatpush.msra.mxu0 %v156_v0  ;;  %v171_v3 = vld [vmem:[#allocation6 + $0x2f0] sm:$0xff]  ;;  %v154_v4 = vld [vmem:[#allocation6 + $0x268] sm:$0xff] }
  0x14   :  { %231 = vmatpush.msra.mxu1 %v172_v2  ;;  %v170_v5 = vld [vmem:[#allocation6 + $0x2e8] sm:$0xff]  ;;  %v153_v6 = vld [vmem:[#allocation6 + $0x260] sm:$0xff]  ;;  %v152_v8 = vld [vmem:[#allocation6 + $0x258] sm:$0xff] }
  0x15   :  { %212 = vmatpush.msra.mxu0 %v155_v1  ;;  %v169_v7 = vld [vmem:[#allocation6 + $0x2e0] sm:$0xff]  ;;  %v168_v9 = vld [vmem:[#allocation6 + $0x2d8] sm:$0xff]  ;;  %v91_v11 = vld [vmem:[#allocation6 + $0x70] sm:$0xff] }
  0x16   :  { %232 = vmatpush.msra.mxu1 %v171_v3  ;;  %v92_v10 = vld [vmem:[#allocation6 + $0x78] sm:$0xff]  ;;  %v151_v13 = vld [vmem:[#allocation6 + $0x250] sm:$0xff]  ;;  %v90_v15 = vld [vmem:[#allocation6 + $0x68] sm:$0xff] }
  0x17   :  { %213 = vmatpush.msra.mxu0 %v154_v4  ;;  %v108_v12 = vld [vmem:[#allocation6 + $0xf8] sm:$0xff]  ;;  %v167_v14 = vld [vmem:[#allocation6 + $0x2d0] sm:$0xff]  ;;  %251 = vmatpush.msra.mxu2 %v92_v10  ;;  %v150_v17 = vld [vmem:[#allocation6 + $0x248] sm:$0xff] }
  0x18   :  { %233 = vmatpush.msra.mxu1 %v170_v5  ;;  %271 = vmatpush.msra.mxu3 %v108_v12  ;;  %v107_v16 = vld [vmem:[#allocation6 + $0xf0] sm:$0xff]  ;;  %v166_v18 = vld [vmem:[#allocation6 + $0x2c8] sm:$0xff]  ;;  %v89_v20 = vld [vmem:[#allocation6 + $0x60] sm:$0xff] }
  0x19   :  { %214 = vmatpush.msra.mxu0 %v153_v6  ;;  %252 = vmatpush.msra.mxu2 %v91_v11  ;;  %v106_v19 = vld [vmem:[#allocation6 + $0xe8] sm:$0xff]  ;;  %v105_v21 = vld [vmem:[#allocation6 + $0xe0] sm:$0xff]  ;;  %v88_v24 = vld [vmem:[#allocation6 + $0x58] sm:$0xff] }
  0x1a   :  { %234 = vmatpush.msra.mxu1 %v169_v7  ;;  %272 = vmatpush.msra.mxu3 %v107_v16  ;;  %v149_v22 = vld [vmem:[#allocation6 + $0x240] sm:$0xff]  ;;  %v104_v25 = vld [vmem:[#allocation6 + $0xd8] sm:$0xff]  ;;  %v87_v28 = vld [vmem:[#allocation6 + $0x50] sm:$0xff] }
  0x1b   :  { %215 = vmatpush.msra.mxu0 %v152_v8  ;;  %v165_v23 = vld [vmem:[#allocation6 + $0x2c0] sm:$0xff]  ;;  %253 = vmatpush.msra.mxu2 %v90_v15  ;;  %v148_v26 = vld [vmem:[#allocation6 + $0x238] sm:$0xff]  ;;  %v103_v29 = vld [vmem:[#allocation6 + $0xd0] sm:$0xff] }
  0x1c   :  { %235 = vmatpush.msra.mxu1 %v168_v9  ;;  %273 = vmatpush.msra.mxu3 %v106_v19  ;;  %v164_v27 = vld [vmem:[#allocation6 + $0x2b8] sm:$0xff]  ;;  %v147_v30 = vld [vmem:[#allocation6 + $0x230] sm:$0xff]  ;;  %v86_v32 = vld [vmem:[#allocation6 + $0x48] sm:$0xff] }
  0x1d   :  { %216 = vmatpush.msra.mxu0 %v151_v13  ;;  %254 = vmatpush.msra.mxu2 %v89_v20  ;;  %v163_v31 = vld [vmem:[#allocation6 + $0x2b0] sm:$0xff]  ;;  %v102_v33 = vld [vmem:[#allocation6 + $0xc8] sm:$0xff]  ;;  %v85_v36 = vld [vmem:[#allocation6 + $0x40] sm:$0xff] }
  0x1e   :  { %236 = vmatpush.msra.mxu1 %v167_v14  ;;  %274 = vmatpush.msra.mxu3 %v105_v21  ;;  %v146_v34 = vld [vmem:[#allocation6 + $0x228] sm:$0xff]  ;;  %v101_v37 = vld [vmem:[#allocation6 + $0xc0] sm:$0xff]  ;;  %v84_v40 = vld [vmem:[#allocation6 + $0x38] sm:$0xff] }
  0x1f   :  { %217 = vmatpush.msra.mxu0 %v150_v17  ;;  %255 = vmatpush.msra.mxu2 %v88_v24  ;;  %v162_v35 = vld [vmem:[#allocation6 + $0x2a8] sm:$0xff]  ;;  %v145_v38 = vld [vmem:[#allocation6 + $0x220] sm:$0xff]  ;;  %v100_v41 = vld [vmem:[#allocation6 + $0xb8] sm:$0xff] }
  0x20   :  { %237 = vmatpush.msra.mxu1 %v166_v18  ;;  %275 = vmatpush.msra.mxu3 %v104_v25  ;;  %v161_v39 = vld [vmem:[#allocation6 + $0x2a0] sm:$0xff]  ;;  %v144_v42 = vld [vmem:[#allocation6 + $0x218] sm:$0xff]  ;;  %v83_v44 = vld [vmem:[#allocation6 + $0x30] sm:$0xff] }
  0x21   :  { %218 = vmatpush.msra.mxu0 %v149_v22  ;;  %256 = vmatpush.msra.mxu2 %v87_v28  ;;  %v160_v43 = vld [vmem:[#allocation6 + $0x298] sm:$0xff]  ;;  %v99_v45 = vld [vmem:[#allocation6 + $0xb0] sm:$0xff]  ;;  %v82_v48 = vld [vmem:[#allocation6 + $0x28] sm:$0xff] }
  0x22   :  { %238 = vmatpush.msra.mxu1 %v165_v23  ;;  %276 = vmatpush.msra.mxu3 %v103_v29  ;;  %v143_v46 = vld [vmem:[#allocation6 + $0x210] sm:$0xff]  ;;  %v98_v49 = vld [vmem:[#allocation6 + $0xa8] sm:$0xff]  ;;  %v81_v52 = vld [vmem:[#allocation6 + $0x20] sm:$0xff] }
  0x23   :  { %219 = vmatpush.msra.mxu0 %v148_v26  ;;  %257 = vmatpush.msra.mxu2 %v86_v32  ;;  %v159_v47 = vld [vmem:[#allocation6 + $0x290] sm:$0xff]  ;;  %v142_v50 = vld [vmem:[#allocation6 + $0x208] sm:$0xff]  ;;  %v97_v53 = vld [vmem:[#allocation6 + $0xa0] sm:$0xff] }
  0x24   :  { %239 = vmatpush.msra.mxu1 %v164_v27  ;;  %277 = vmatpush.msra.mxu3 %v102_v33  ;;  %v158_v51 = vld [vmem:[#allocation6 + $0x288] sm:$0xff]  ;;  %v141_v54 = vld [vmem:[#allocation6 + $0x200] sm:$0xff]  ;;  %v124_v56 = vld [vmem:[#allocation6 + $0x178] sm:$0xff] }
  0x25   :  { %220 = vmatpush.msra.mxu0 %v147_v30  ;;  %258 = vmatpush.msra.mxu2 %v85_v36  ;;  %v157_v55 = vld [vmem:[#allocation6 + $0x280] sm:$0xff]  ;;  %v140_v57 = vld [vmem:[#allocation6 + $0x1f8] sm:$0xff]  ;;  %v123_v60 = vld [vmem:[#allocation6 + $0x170] sm:$0xff] }
  0x26   :  { %240 = vmatpush.msra.mxu1 %v163_v31  ;;  %278 = vmatpush.msra.mxu3 %v101_v37  ;;  %v80_v58 = vld [vmem:[#allocation6 + $0x18] sm:$0xff]  ;;  %v139_v61 = vld [vmem:[#allocation6 + $0x1f0] sm:$0xff]  ;;  %v122_v0 = vld [vmem:[#allocation6 + $0x168] sm:$0xff] }
  0x27   :  { %221 = vmatpush.msra.mxu0 %v146_v34  ;;  %259 = vmatpush.msra.mxu2 %v84_v40  ;;  %v96_v59 = vld [vmem:[#allocation6 + $0x98] sm:$0xff]  ;;  %v79_v62 = vld [vmem:[#allocation6 + $0x10] sm:$0xff]  ;;  %v138_v1 = vld [vmem:[#allocation6 + $0x1e8] sm:$0xff] }
  0x28   :  { %241 = vmatpush.msra.mxu1 %v162_v35  ;;  %279 = vmatpush.msra.mxu3 %v100_v41  ;;  %v95_v63 = vld [vmem:[#allocation6 + $0x90] sm:$0xff]  ;;  %v78_v2 = vld [vmem:[#allocation6 + $0x8] sm:$0xff]  ;;  %v121_v4 = vld [vmem:[#allocation6 + $0x160] sm:$0xff] }
  0x29   :  { %222 = vmatpush.msra.mxu0 %v145_v38  ;;  %260 = vmatpush.msra.mxu2 %v83_v44  ;;  %v94_v3 = vld [vmem:[#allocation6 + $0x88] sm:$0xff]  ;;  %v137_v5 = vld [vmem:[#allocation6 + $0x1e0] sm:$0xff]  ;;  %v120_v8 = vld [vmem:[#allocation6 + $0x158] sm:$0xff] }
  0x2a   :  { %242 = vmatpush.msra.mxu1 %v161_v39  ;;  %280 = vmatpush.msra.mxu3 %v99_v45  ;;  %v77_v6 = vld [vmem:[#allocation6] sm:$0xff]  ;;  %v136_v9 = vld [vmem:[#allocation6 + $0x1d8] sm:$0xff]  ;;  %v205_v10 = vld [vmem:[#allocation2] sm:$0xff] }
  0x2b   :  { %223 = vmatpush.msra.mxu0 %v144_v42  ;;  %261 = vmatpush.msra.mxu2 %v82_v48  ;;  %v93_v7 = vld [vmem:[#allocation6 + $0x80] sm:$0xff]  ;;  %v206_v11 = vld [vmem:[#allocation2 + $0x8] sm:$0xff]  ;;  %v119_v12 = vld [vmem:[#allocation6 + $0x150] sm:$0xff] }
  0x2c   :  { %243 = vmatpush.msra.mxu1 %v160_v43  ;;  %281 = vmatpush.msra.mxu3 %v98_v49  ;;  %v135_v13 = vld [vmem:[#allocation6 + $0x1d0] sm:$0xff]  ;;  %v210_v15 = vld [vmem:[#allocation4 + $0x8] sm:$0xff]  ;;  %v118_v16 = vld [vmem:[#allocation6 + $0x148] sm:$0xff] }
  0x2d   :  { %224 = vmatpush.msra.mxu0 %v143_v46  ;;  %262 = vmatpush.msra.mxu2 %v81_v52  ;;  %v209_v14 = vld [vmem:[#allocation4] sm:$0xff]  ;;  %v134_v17 = vld [vmem:[#allocation6 + $0x1c8] sm:$0xff]  ;;  %v188_v18 = vld [vmem:[#allocation6 + $0x378] sm:$0xff] }
  0x2e   :  { %244 = vmatpush.msra.mxu1 %v159_v47  ;;  %282 = vmatpush.msra.mxu3 %v97_v53  ;;  %v117_v19 = vld [vmem:[#allocation6 + $0x140] sm:$0xff]  ;;  %v187_v21 = vld [vmem:[#allocation6 + $0x370] sm:$0xff]  ;;  %v116_v22 = vld [vmem:[#allocation6 + $0x138] sm:$0xff] }
  0x2f   :  { %225 = vmatpush.msra.mxu0 %v142_v50  ;;  %263 = vmatpush.msra.mxu2 %v80_v58  ;;  %v133_v20 = vld [vmem:[#allocation6 + $0x1c0] sm:$0xff]  ;;  %v132_v23 = vld [vmem:[#allocation6 + $0x1b8] sm:$0xff]  ;;  %v186_v24 = vld [vmem:[#allocation6 + $0x368] sm:$0xff] }
  0x30   :  { %245 = vmatpush.msra.mxu1 %v158_v51  ;;  %283 = vmatpush.msra.mxu3 %v96_v59  ;;  %v115_v25 = vld [vmem:[#allocation6 + $0x130] sm:$0xff]  ;;  %v185_v27 = vld [vmem:[#allocation6 + $0x360] sm:$0xff]  ;;  %v114_v28 = vld [vmem:[#allocation6 + $0x128] sm:$0xff] }
  0x31   :  { %226 = vmatpush.msra.mxu0 %v141_v54  ;;  %264 = vmatpush.msra.mxu2 %v79_v62  ;;  %v131_v26 = vld [vmem:[#allocation6 + $0x1b0] sm:$0xff]  ;;  %v130_v29 = vld [vmem:[#allocation6 + $0x1a8] sm:$0xff]  ;;  %v184_v30 = vld [vmem:[#allocation6 + $0x358] sm:$0xff] }
  0x32   :  { %246 = vmatpush.msra.mxu1 %v157_v55  ;;  %284 = vmatpush.msra.mxu3 %v95_v63  ;;  %v113_v31 = vld [vmem:[#allocation6 + $0x120] sm:$0xff]  ;;  %v183_v33 = vld [vmem:[#allocation6 + $0x350] sm:$0xff]  ;;  %v112_v34 = vld [vmem:[#allocation6 + $0x118] sm:$0xff] }
  0x33   :  { %291 = vmatpush.msrb.mxu0 %v124_v56  ;;  %265 = vmatpush.msra.mxu2 %v78_v2  ;;  %v129_v32 = vld [vmem:[#allocation6 + $0x1a0] sm:$0xff]  ;;  %v128_v35 = vld [vmem:[#allocation6 + $0x198] sm:$0xff]  ;;  %v182_v36 = vld [vmem:[#allocation6 + $0x348] sm:$0xff] }
  0x34   :  { %311 = vmatpush.msrb.mxu1 %v140_v57  ;;  %285 = vmatpush.msra.mxu3 %v94_v3  ;;  %v111_v37 = vld [vmem:[#allocation6 + $0x110] sm:$0xff]  ;;  %v110_v39 = vld [vmem:[#allocation6 + $0x108] sm:$0xff]  ;;  %v109_v41 = vld [vmem:[#allocation6 + $0x100] sm:$0xff] }
  0x35   :  { %292 = vmatpush.msrb.mxu0 %v123_v60  ;;  %266 = vmatpush.msra.mxu2 %v77_v6  ;;  %v127_v38 = vld [vmem:[#allocation6 + $0x190] sm:$0xff]  ;;  %v126_v40 = vld [vmem:[#allocation6 + $0x188] sm:$0xff]  ;;  %v125_v42 = vld [vmem:[#allocation6 + $0x180] sm:$0xff] }
  0x36   :  { %312 = vmatpush.msrb.mxu1 %v139_v61  ;;  %286 = vmatpush.msra.mxu3 %v93_v7  ;;  %v207_v43 = vld [vmem:[#allocation2 + $0x10] sm:$0xff]  ;;  %v208_v44 = vld [vmem:[#allocation2 + $0x18] sm:$0xff]  ;;  %v180_v46 = vld [vmem:[#allocation6 + $0x338] sm:$0xff] }
  0x37   :  { %293 = vmatpush.msrb.mxu0 %v122_v0  ;;  %267 = vmatmul.f32.vlgmr.msra.gmra.mxu2 %v205_v10  ;;  %v181_v45 = vld [vmem:[#allocation6 + $0x340] sm:$0xff]  ;;  %v179_v47 = vld [vmem:[#allocation6 + $0x330] sm:$0xff]  ;;  %v178_v48 = vld [vmem:[#allocation6 + $0x328] sm:$0xff] }
  0x38   :  { %313 = vmatpush.msrb.mxu1 %v138_v1  ;;  %287 = vmatmul.f32.vlgmr.msra.gmra.mxu3 %v206_v11  ;;  %v177_v49 = vld [vmem:[#allocation6 + $0x320] sm:$0xff]  ;;  %v176_v50 = vld [vmem:[#allocation6 + $0x318] sm:$0xff]  ;;  %v175_v51 = vld [vmem:[#allocation6 + $0x310] sm:$0xff] }
  0x39   :  { %294 = vmatpush.msrb.mxu0 %v121_v4  ;;  %247 = vmatmul.f32.vlgmr.msra.gmra.mxu1 %v210_v15  ;;  %v174_v52 = vld [vmem:[#allocation6 + $0x308] sm:$0xff]  ;;  %v173_v53 = vld [vmem:[#allocation6 + $0x300] sm:$0xff]  ;;  %v204_v54 = vld [vmem:[#allocation6 + $0x3f8] sm:$0xff] }
  0x3a   :  { %314 = vmatpush.msrb.mxu1 %v137_v5  ;;  %227 = vmatmul.f32.vlgmr.msra.gmra.mxu0 %v209_v14  ;;  %v203_v55 = vld [vmem:[#allocation6 + $0x3f0] sm:$0xff]  ;;  %v202_v56 = vld [vmem:[#allocation6 + $0x3e8] sm:$0xff]  ;;  %v201_v57 = vld [vmem:[#allocation6 + $0x3e0] sm:$0xff] }
  0x3b   :  { %295 = vmatpush.msrb.mxu0 %v120_v8  ;;  %335 = vmatpush.msrb.mxu2 %v188_v18  ;;  %v200_v58 = vld [vmem:[#allocation6 + $0x3d8] sm:$0xff]  ;;  %v199_v59 = vld [vmem:[#allocation6 + $0x3d0] sm:$0xff]  ;;  %v198_v60 = vld [vmem:[#allocation6 + $0x3c8] sm:$0xff] }
  0x3c   :  { %315 = vmatpush.msrb.mxu1 %v136_v9  ;;  %356 = vmatpush.msrb.mxu3 %v204_v54  ;;  %v197_v63 = vld [vmem:[#allocation6 + $0x3c0] sm:$0xff]  ;;  %v196_v1 = vld [vmem:[#allocation6 + $0x3b8] sm:$0xff]  ;;  %v195_v3 = vld [vmem:[#allocation6 + $0x3b0] sm:$0xff] }
  0x3d   :  { %296 = vmatpush.msrb.mxu0 %v119_v12  ;;  %336 = vmatpush.msrb.mxu2 %v187_v21  ;;  %v194_v5 = vld [vmem:[#allocation6 + $0x3a8] sm:$0xff]  ;;  %v193_v7 = vld [vmem:[#allocation6 + $0x3a0] sm:$0xff]  ;;  %v192_v9 = vld [vmem:[#allocation6 + $0x398] sm:$0xff] }
  0x3e   :  { %316 = vmatpush.msrb.mxu1 %v135_v13  ;;  %357 = vmatpush.msrb.mxu3 %v203_v55  ;;  %v393_v13 = vld [vmem:[#allocation7] ss:$0 sm:$0xff]  ;;  %v190_v18 = vld [vmem:[#allocation6 + $0x388] sm:$0xff] }
  0x3f   :  { %297 = vmatpush.msrb.mxu0 %v118_v16  ;;  %337 = vmatpush.msrb.mxu2 %v186_v24  ;;  %v395_v24 = vld [vmem:[#allocation7 + $0x2] ss:$0 sm:$0xff] }
  0x40   :  { %317 = vmatpush.msrb.mxu1 %v134_v17  ;;  %358 = vmatpush.msrb.mxu3 %v202_v56  ;;  %v191_v17 = vld [vmem:[#allocation6 + $0x390] sm:$0xff] }
  0x41   :  { %298 = vmatpush.msrb.mxu0 %v117_v19  ;;  %338 = vmatpush.msrb.mxu2 %v185_v27  ;;  %v189_v19 = vld [vmem:[#allocation6 + $0x380] sm:$0xff] }
  0x42   :  { %318 = vmatpush.msrb.mxu1 %v133_v20  ;;  %359 = vmatpush.msrb.mxu3 %v201_v57  ;;  %v394_v20 = vld [vmem:[#allocation7 + $0x1] ss:$0 sm:$0xff] }
  0x43   :  { %299 = vmatpush.msrb.mxu0 %v116_v22  ;;  %339 = vmatpush.msrb.mxu2 %v184_v30 }
  0x44   :  { %319 = vmatpush.msrb.mxu1 %v132_v23  ;;  %360 = vmatpush.msrb.mxu3 %v200_v58 }
  0x45   :  { %300 = vmatpush.msrb.mxu0 %v115_v25  ;;  %340 = vmatpush.msrb.mxu2 %v183_v33 }
  0x46   :  { %320 = vmatpush.msrb.mxu1 %v131_v26  ;;  %361 = vmatpush.msrb.mxu3 %v199_v59 }
  0x47   :  { %301 = vmatpush.msrb.mxu0 %v114_v28  ;;  %341 = vmatpush.msrb.mxu2 %v182_v36 }
  0x48   :  { %321 = vmatpush.msrb.mxu1 %v130_v29  ;;  %362 = vmatpush.msrb.mxu3 %v198_v60 }
  0x49   :  { %302 = vmatpush.msrb.mxu0 %v113_v31  ;;  %342 = vmatpush.msrb.mxu2 %v181_v45 }
  0x4a   :  { %322 = vmatpush.msrb.mxu1 %v129_v32  ;;  %363 = vmatpush.msrb.mxu3 %v197_v63 }
  0x4b   :  { %303 = vmatpush.msrb.mxu0 %v112_v34  ;;  %343 = vmatpush.msrb.mxu2 %v180_v46 }
  0x4c   :  { %323 = vmatpush.msrb.mxu1 %v128_v35  ;;  %364 = vmatpush.msrb.mxu3 %v196_v1 }
  0x4d   :  { %304 = vmatpush.msrb.mxu0 %v111_v37  ;;  %344 = vmatpush.msrb.mxu2 %v179_v47 }
  0x4e   :  { %324 = vmatpush.msrb.mxu1 %v127_v38  ;;  %365 = vmatpush.msrb.mxu3 %v195_v3 }
  0x4f   :  { %305 = vmatpush.msrb.mxu0 %v110_v39  ;;  %345 = vmatpush.msrb.mxu2 %v178_v48 }
  0x50   :  { %325 = vmatpush.msrb.mxu1 %v126_v40  ;;  %366 = vmatpush.msrb.mxu3 %v194_v5 }
  0x51   :  { %306 = vmatpush.msrb.mxu0 %v109_v41  ;;  %346 = vmatpush.msrb.mxu2 %v177_v49 }
  0x52   :  { %326 = vmatpush.msrb.mxu1 %v125_v42  ;;  %307 = vmatmul.f32.vlgmr.msrb.gmra.mxu0 %v207_v43 }
  0x53   :  { %327 = vmatmul.f32.vlgmr.msrb.gmra.mxu1 %v208_v44  ;;  %347 = vmatpush.msrb.mxu2 %v176_v50 }
  0x54   :  { %367 = vmatpush.msrb.mxu3 %v193_v7 }
  0x55   :  { %348 = vmatpush.msrb.mxu2 %v175_v51 }
  0x56   :  { %368 = vmatpush.msrb.mxu3 %v192_v9 }
  0x57   :  { %349 = vmatpush.msrb.mxu2 %v174_v52 }
  0x58   :  { %369 = vmatpush.msrb.mxu3 %v191_v17 }
  0x59   :  { %350 = vmatpush.msrb.mxu2 %v173_v53 }
  0x5a   :  { %370 = vmatpush.msrb.mxu3 %v190_v18 }
  0x5c   :  { %371 = vmatpush.msrb.mxu3 %v189_v19 }
  0xb6   :  { %v248_v62 = vpop.f32.mrf.mxu1 }
  0xb7   :  { %v228_v61 = vpop.f32.mrf.mxu0 }
  0xb8   :  { %v249_v0 = vadd.f32 %v248_v62, %v228_v61 }
  0xba   :  { %v268_v2 = vpop.f32.mrf.mxu2 }
  0xbb   :  { %v269_v4 = vadd.f32 %v268_v2, %v249_v0  ;;  %v288_v6 = vpop.f32.mrf.mxu3 }
  0xbd   :  { %v289_v8 = vadd.f32 %v288_v6, %v269_v4 }
  0xcf   :  { %v308_v10 = vpop.f32.mrf.mxu0 }
  0xd0   :  { %v328_v11 = vpop.f32.mrf.mxu1  ;;  %v309_v12 = vadd.f32 %v308_v10, %v289_v8 }
  0xd2   :  { %v329_v14 = vadd.f32 %v328_v11, %v309_v12 }
  0xd4   :  { %v332_v15 = vadd.f32 %v393_v13, %v329_v14 }
  0xd6   :  { %v333_v16 = vmax.f32 %v332_v15, 0.0 }
  0xd8   :  { %351 = vmatmul.f32.vlgmr.msrb.gmra.mxu2 %v333_v16 }
 0x15b   :  { %v352_v21 = vpop.f32.mrf.mxu2 }
 0x15c   :  { %v353_v22 = vadd.f32 %v394_v20, %v352_v21 }
 0x15e   :  { %v355_v23 = vmax.f32 %v353_v22, 0.0 }
 0x160   :  { %372 = vmatmul.f32.vlgmr.msrb.gmra.mxu3 %v355_v23 }
 0x1e3   :  { %v373_v25 = vpop.f32.mrf.mxu3 }
 0x1e4   :  { %v377_v26 = vadd.f32 %v395_v24, %v373_v25 }
 0x1e6   :  { %379 = vst.msk [vmem:[%s548_s4] sm:$0xff] %vm378_vm0, %v377_v26 }
 0x1e7   :  { %384 = vsyncpa [#allocation3], 1 }
 0x1e8   :  { %385 = vsyncpa [#allocation5], 1 }
 0x1e9   :  { %386 = vsyncpa [#allocation8], 1 }

</bundles_post_ra>
